<compile_context>
chip_gen: v5e
topology: v5e:2x2
jax: 0.10.0
libtpu: 0.0.40
codegen_flags: <defaults>
</compile_context>

<pallas_src>
import jax
import jax.numpy as jnp
from jax.experimental import pallas as pl
from jax.experimental.pallas import tpu as pltpu


_LANES = 128      # vreg lane width (same on v5e / v6e / v7x)
_SUBLANES = 8     # vreg sublane count


def _round_up(x, m):
    return (x + m - 1) // m * m


# ---------------------------------------------------------------------------
# Identity (copy) kernel: one VMEM-resident block in, same block out.
# ---------------------------------------------------------------------------
def _identity_copy_kernel(x_ref, o_ref):
    o_ref[...] = x_ref[...]


def identity_pallas(x):
    """Pallas implementation of MyModel.forward: returns x unchanged."""
    orig_shape = x.shape
    flat = x.reshape(-1)
    n = flat.shape[0]

    # Lay the data out as (rows, 128): last dim is exactly one vreg of lanes,
    # so every store is a full, unmasked vst (no masked partial stores).
    tile_elems = _LANES * _SUBLANES
    padded = _round_up(n, tile_elems)
    if padded != n:                       # only pad when actually needed
        flat = jnp.pad(flat, (0, padded - n))
    rows = padded // _LANES
    x2d = flat.reshape(rows, _LANES)

    # Biggest row-block (multiple of 8) that divides `rows` and keeps a
    # single f32 buffer at <= 2 MiB, well inside the scoped-VMEM default on
    # every generation (16 MiB v5e / 32 MiB v6e,v7x) even with the
    # double-buffered input + output.
    max_block_rows = 4096                 # 4096 * 128 * 4 B = 2 MiB
    block_rows = min(rows, max_block_rows)
    while rows % block_rows != 0:
        block_rows -= _SUBLANES           # rows is a multiple of 8 -> terminates
    grid = (rows // block_rows,)

    out2d = pl.pallas_call(
        _identity_copy_kernel,
        out_shape=jax.ShapeDtypeStruct((rows, _LANES), x2d.dtype),
        grid_spec=pltpu.PrefetchScalarGridSpec(
            num_scalar_prefetch=0,
            grid=grid,
            in_specs=[pl.BlockSpec((block_rows, _LANES), lambda i: (i, 0))],
            out_specs=pl.BlockSpec((block_rows, _LANES), lambda i: (i, 0)),
        ),
        compiler_params=pltpu.CompilerParams(
            dimension_semantics=("parallel",)),   # megacore-shardable on v7x
    )(x2d)

    out = out2d.reshape(-1)
    if padded != n:
        out = out[:n]
    return out.reshape(orig_shape)


def my_model_forward(x, num_classes=12):
    # num_classes is accepted (as in the reference __init__) but the reference
    # forward does not use it; the forward is the identity.
    del num_classes
    return identity_pallas(x)


if __name__ == "__main__":
    key = jax.random.PRNGKey(0)
    x = jax.random.normal(key, (2, 4, 16, 16), jnp.float32)   # NCHW input

    fwd = jax.jit(my_model_forward)
    out = fwd(x)
    out = jax.block_until_ready(out)

    assert out.shape == x.shape, out.shape
    assert bool(jnp.array_equal(out, x)), "identity forward mismatch"
    assert bool(jnp.all(jnp.isfinite(out)))
    print("KERNEL_OK")
</pallas_src>

<mosaic_0001>
module attributes {stable_mosaic.version = 11 : i64} {
  func.func @_identity_copy_kernel(%arg0: i32, %arg1: memref<16x128xf32, #tpu.memory_space<vmem>>, %arg2: memref<16x128xf32, #tpu.memory_space<vmem>>) attributes {dimension_semantics = [#tpu.dimension_semantics<parallel>], iteration_bounds = array<i64: 1>, scalar_prefetch = 0 : i64, scratch_operands = 0 : i64, tpu.core_type = #tpu.core_type<tc>, window_params = [{transform_indices = @transform_0, window_bounds = array<i64: 16, 128>}, {transform_indices = @transform_1, window_bounds = array<i64: 16, 128>}]} {
    %c0 = arith.constant 0 : index
    %c0_0 = arith.constant 0 : index
    %0 = vector.load %arg1[%c0, %c0_0] : memref<16x128xf32, #tpu.memory_space<vmem>>, vector<16x128xf32>
    %c0_1 = arith.constant 0 : index
    %c0_2 = arith.constant 0 : index
    %1 = vector.load %arg2[%c0_1, %c0_2] : memref<16x128xf32, #tpu.memory_space<vmem>>, vector<16x128xf32>
    tpu.vector_store %arg2[%c0_1, %c0_2], %0 {strides = array<i32>} : memref<16x128xf32, #tpu.memory_space<vmem>>, vector<16x128xf32>,
    return
  }
  func.func @transform_0(%arg0: i32) -> (i32, i32) {
    %c0_i32 = arith.constant 0 : i32
    %c0_i32_0 = arith.constant 0 : i32
    return %arg0, %c0_i32 : i32, i32
  }
  func.func @transform_1(%arg0: i32) -> (i32, i32) {
    %c0_i32 = arith.constant 0 : i32
    %c0_i32_0 = arith.constant 0 : i32
    return %arg0, %c0_i32 : i32, i32
  }
}

</mosaic_0001>

<bundles_post_ra>
// kernel: my_model_forward.1
= control target key start
LH: loop header
LB: loop body
LE: loop exit
PB: predicated region body
PF: predicated region fallthrough
CT: control target
= control target key end

     0   :  { %s38_s0 = inlined_call_operand.vmem [shape: f32[16,128], index: 0, kind: input, shape index: {}]   ;;  %s39_s1 = inlined_call_operand.vmem [shape: f32[16,128], index: 1, kind: output, shape index: {}]  }
   0x1   :  { %v8_v0 = vld [vmem:[%s38_s0] sm:$0xff]  ;;  %v9_v1 = vld [vmem:[%s38_s0 + $0x8] sm:$0xff] }
   0x2   :  { %10 = vst [vmem:[%s39_s1] sm:$0xff] %v8_v0 }
   0x3   :  { %11 = vst [vmem:[%s39_s1 + $0x8] sm:$0xff] %v9_v1 }

</bundles_post_ra>
